<compile_context>
chip_gen: v5e
topology: v5e:2x2
jax: 0.10.0
libtpu: 0.0.40
codegen_flags: <defaults>
</compile_context>

<pallas_src>
import numpy as np
import jax
import jax.numpy as jnp
from jax.experimental import pallas as pl
from jax.experimental.pallas import tpu as pltpu

LANE = 128


def _cdiv(a, b):
    return -(-a // b)


def _round_up(n, m):
    return _cdiv(n, m) * m


# ----------------------------- Pallas kernel ------------------------------- #
def maf_kernel(x_ref, w1_ref, w2_ref, b2_ref, w3_ref, b3_ref, u_ref, ld_ref):
    # x_ref: (tile_r, Dp) lane-dense rows.  Columns [0:D] hold the data,
    # [D:D+G] the genre one-hot, [D+G] a constant 1, the rest zeros.  Wg and b1
    # were folded into the matching rows of w1, so the first matmul also
    # applies the genre conditioning and layer-1 bias.
    x = x_ref[...]

    h1 = jnp.maximum(
        jnp.dot(x, w1_ref[...], preferred_element_type=jnp.float32), 0.0)
    h2 = jnp.maximum(
        jnp.dot(h1, w2_ref[...], preferred_element_type=jnp.float32)
        + b2_ref[...], 0.0)

    # Fused mu / log_p head: one matmul, sliced at the 128-lane boundary.
    y = jnp.dot(h2, w3_ref[...], preferred_element_type=jnp.float32) \
        + b3_ref[...]
    Dp = x.shape[-1]
    mu = y[:, :Dp]
    log_p = y[:, Dp:]

    # MAF transform.  mu / log_p are exactly zero on the padded lanes, so the
    # log_p row sums are exact; the junk in u's padded lanes (genre/one lanes
    # of x) is sliced away in the wrapper.
    u_ref[...] = (x - mu) * jnp.exp(0.5 * log_p)

    # Lane-dense log-det slab: per-row sum broadcast across all 128 lanes
    # (avoids a masked (tile_r, 1) store path); the wrapper reads lane 0.
    ld_ref[...] = jnp.broadcast_to(
        jnp.sum(log_p, axis=-1, keepdims=True), ld_ref.shape)


# --------------------------- parameter packing ------------------------------ #
def pack_params(params, Wg, D, H1, H2, num_genres):
    """Zero-pad weights to lane-dense shapes, fuse the mu/log_p heads and fold
    the genre conditioning (Wg) and b1 into extra rows of w1.

    Padded weight rows / cols and biases are zero, so the math stays exact.
    Done once at prep time (glue, not hot path).
    """
    (w1m, b1, w2m, b2, w3mu_m, b3mu, w3lp_m, b3lp) = params
    feat = D + num_genres + 1                 # data + genre one-hot + const 1
    Dp = _round_up(feat, LANE)
    H1p = _round_up(H1, LANE)
    H2p = _round_up(H2, LANE)
    f32 = jnp.float32

    # Layer 1: rows [0:D] masked weights, [D:D+G] genre weights, [D+G] = b1.
    w1p = (jnp.zeros((Dp, H1p), f32)
           .at[:D, :H1].set(w1m)
           .at[D:D + num_genres, :H1].set(Wg)
           .at[D + num_genres, :H1].set(b1.reshape(-1)))
    w2p = jnp.zeros((H1p, H2p), f32).at[:H1, :H2].set(w2m)
    b2p = jnp.zeros((1, H2p), f32).at[:, :H2].set(b2)
    # Fused head: cols [0:D] = mu weights, [Dp:Dp+D] = log_p weights.
    w3p = (jnp.zeros((H2p, 2 * Dp), f32)
           .at[:H2, :D].set(w3mu_m)
           .at[:H2, Dp:Dp + D].set(w3lp_m))
    b3p = (jnp.zeros((1, 2 * Dp), f32)
           .at[:, :D].set(b3mu)
           .at[:, Dp:Dp + D].set(b3lp))
    # TODO(synk): when H1/H2 grow toward the v7x 64 MiB VMEM ceiling, pack the
    # weights in bf16 and use pipeline_mode=pl.Buffered(1) on their BlockSpecs.
    return (w1p, w2p, b2p, w3p, b3p), (Dp, H1p, H2p)


# ------------------------------- wrapper ------------------------------------ #
def _row_tiling(R, max_row_tile):
    """Multiple-of-8 row tile, balanced so the tail tile is not mostly
    padding, with >= 2 grid steps whenever R > 8 so both v7x TensorCores get
    work (v5e/v6e just see one extra ~0.35us step)."""
    if R <= 8:
        return 8, 1
    n_tiles = max(2, _cdiv(R, max(8, max_row_tile)))
    tile_r = _round_up(_cdiv(R, n_tiles), 8)
    n_tiles = _cdiv(R, tile_r)
    return tile_r, n_tiles


def maf_layer_forward(x, genres_onehot, packed, dims, *, max_row_tile=512):
    """x: (B, T, D) f32, genres_onehot: (B, G) f32.  Returns (u, logdet)."""
    B, T, D = x.shape
    G = genres_onehot.shape[-1]
    w1p, w2p, b2p, w3p, b3p = packed
    Dp, H1p, H2p = dims
    feat = D + G + 1

    R = B * T
    tile_r, n_tiles = _row_tiling(R, max_row_tile)
    Rp = n_tiles * tile_r

    # Augmented, lane-dense input rows: [x | genre one-hot | 1 | zeros].
    g_rows = jnp.broadcast_to(genres_onehot[:, None, :],
                              (B, T, G)).reshape(R, G)
    x_aug = jnp.concatenate(
        [x.reshape(R, D), g_rows, jnp.ones((R, 1), jnp.float32)], axis=-1)
    x_pad = jnp.pad(x_aug, ((0, Rp - R), (0, Dp - feat)))

    full = lambda shape: pl.BlockSpec(shape, lambda r: (0,) * len(shape))
    rows = lambda cols: pl.BlockSpec((tile_r, cols), lambda r: (r, 0))

    u_pad, ld_slab = pl.pallas_call(
        maf_kernel,
        out_shape=(
            jax.ShapeDtypeStruct((Rp, Dp), jnp.float32),
            jax.ShapeDtypeStruct((Rp, LANE), jnp.float32),
        ),
        grid_spec=pltpu.PrefetchScalarGridSpec(
            num_scalar_prefetch=0,
            grid=(n_tiles,),
            in_specs=[
                rows(Dp),             # augmented x rows (lane-dense)
                full((Dp, H1p)),      # layer-1 weights (+ genre + b1 rows)
                full((H1p, H2p)),     # layer-2 masked weights
                full((1, H2p)),       # layer-2 bias
                full((H2p, 2 * Dp)),  # fused mu/log_p head weights
                full((1, 2 * Dp)),    # fused head bias
            ],
            out_specs=[
                rows(Dp),             # u rows (lane-dense)
                rows(LANE),           # per-row log_p sums, lane-dense slab
            ],
        ),
        compiler_params=pltpu.CompilerParams(
            dimension_semantics=("parallel",)),
    )(x_pad, w1p, w2p, b2p, w3p, b3p)

    u = u_pad[:R, :D].reshape(B, T, D)
    logdet = 0.5 * jnp.sum(ld_slab[:R, 0].reshape(B, T), axis=1)
    return u, logdet


# ------------------------- deterministic parameters ------------------------- #
def build_params(D, H1, H2, key):
    # Standard MADE autoregressive degree assignment (univariate).
    d_in = np.arange(1, D + 1)                                  # input degrees
    d_h1 = (np.arange(H1) % max(1, D - 1)) + 1
    d_h2 = (np.arange(H2) % max(1, D - 1)) + 1
    M1 = (d_h1[None, :] >= d_in[:, None]).astype(np.float32)    # (D, H1)
    M2 = (d_h2[None, :] >= d_h1[:, None]).astype(np.float32)    # (H1, H2)
    Mo = (d_in[None, :] > d_h2[:, None]).astype(np.float32)     # (H2, D)

    ks = jax.random.split(key, 8)
    w1 = jax.random.normal(ks[0], (D, H1), jnp.float32) * 0.1
    b1 = jax.random.normal(ks[1], (1, H1), jnp.float32) * 0.01
    w2 = jax.random.normal(ks[2], (H1, H2), jnp.float32) * 0.1
    b2 = jax.random.normal(ks[3], (1, H2), jnp.float32) * 0.01
    w3mu = jax.random.normal(ks[4], (H2, D), jnp.float32) * 0.1
    b3mu = jax.random.normal(ks[5], (1, D), jnp.float32) * 0.01
    w3lp = jax.random.normal(ks[6], (H2, D), jnp.float32) * 0.1
    b3lp = jax.random.normal(ks[7], (1, D), jnp.float32) * 0.01

    # Pre-apply the autoregressive masks to the weights (glue, not hot path).
    return (w1 * jnp.asarray(M1), b1,
            w2 * jnp.asarray(M2), b2,
            w3mu * jnp.asarray(Mo), b3mu,
            w3lp * jnp.asarray(Mo), b3lp)


def reference_forward(x, genres_onehot, params, Wg):
    (w1m, b1, w2m, b2, w3mu_m, b3mu, w3lp_m, b3lp) = params
    genre_bias = (genres_onehot @ Wg)[:, None, :]               # (B, 1, H1)
    h1 = jnp.maximum(jnp.einsum("btd,dh->bth", x, w1m) + b1 + genre_bias, 0.0)
    h2 = jnp.maximum(jnp.einsum("bth,hg->btg", h1, w2m) + b2, 0.0)
    mu = jnp.einsum("btg,gd->btd", h2, w3mu_m) + b3mu
    log_p = jnp.einsum("btg,gd->btd", h2, w3lp_m) + b3lp
    u = (x - mu) * jnp.exp(0.5 * log_p)
    return u, 0.5 * jnp.sum(log_p, axis=(1, 2))


# ---------------------------------- main ------------------------------------ #
if __name__ == "__main__":
    B, T, D = 2, 8, 32          # input_size = (T, D)
    H1, H2 = 64, 64             # hidden_sizes = [64, 64]
    num_genres = 4

    key = jax.random.PRNGKey(0)
    kx, kg, kp, kwg = jax.random.split(key, 4)

    x = jax.random.normal(kx, (B, T, D), jnp.float32)
    genres = jax.random.randint(kg, (B,), 0, num_genres)
    genres_onehot = jax.nn.one_hot(genres, num_genres, dtype=jnp.float32)

    params = build_params(D, H1, H2, kp)
    # Genre conditioning weights: one-hot(genres) @ Wg is an additive bias on
    # hidden layer 1; folded into w1 at pack time.
    Wg = jax.random.normal(kwg, (num_genres, H1), jnp.float32) * 0.1
    packed, dims = pack_params(params, Wg, D, H1, H2, num_genres)

    fwd = jax.jit(lambda xx, gg, pk: maf_layer_forward(xx, gg, pk, dims))
    u, logdet = fwd(x, genres_onehot, packed)
    u = jax.block_until_ready(u)
    logdet = jax.block_until_ready(logdet)

    u_ref, logdet_ref = reference_forward(x, genres_onehot, params, Wg)
    np.testing.assert_allclose(np.asarray(u), np.asarray(u_ref),
                               rtol=1e-5, atol=1e-5)
    np.testing.assert_allclose(np.asarray(logdet), np.asarray(logdet_ref),
                               rtol=1e-5, atol=1e-5)

    print("KERNEL_OK")
</pallas_src>

<mosaic_0001>
module attributes {stable_mosaic.version = 11 : i64} {
  func.func @maf_kernel(%arg0: i32, %arg1: memref<8x128xf32, #tpu.memory_space<vmem>>, %arg2: memref<128x128xf32, #tpu.memory_space<vmem>>, %arg3: memref<128x128xf32, #tpu.memory_space<vmem>>, %arg4: memref<1x128xf32, #tpu.memory_space<vmem>>, %arg5: memref<128x256xf32, #tpu.memory_space<vmem>>, %arg6: memref<1x256xf32, #tpu.memory_space<vmem>>, %arg7: memref<8x128xf32, #tpu.memory_space<vmem>>, %arg8: memref<8x128xf32, #tpu.memory_space<vmem>>) attributes {dimension_semantics = [#tpu.dimension_semantics<parallel>], iteration_bounds = array<i64: 2>, scalar_prefetch = 0 : i64, scratch_operands = 0 : i64, tpu.core_type = #tpu.core_type<tc>, window_params = [{transform_indices = @transform_0, window_bounds = array<i64: 8, 128>}, {pipeline_mode = #tpu.pipeline_mode<synchronous>, transform_indices = @transform_1, window_bounds = array<i64: 128, 128>}, {pipeline_mode = #tpu.pipeline_mode<synchronous>, transform_indices = @transform_2, window_bounds = array<i64: 128, 128>}, {pipeline_mode = #tpu.pipeline_mode<synchronous>, transform_indices = @transform_3, window_bounds = array<i64: 1, 128>}, {pipeline_mode = #tpu.pipeline_mode<synchronous>, transform_indices = @transform_4, window_bounds = array<i64: 128, 256>}, {pipeline_mode = #tpu.pipeline_mode<synchronous>, transform_indices = @transform_5, window_bounds = array<i64: 1, 256>}, {transform_indices = @transform_6, window_bounds = array<i64: 8, 128>}, {transform_indices = @transform_7, window_bounds = array<i64: 8, 128>}]} {
    %c0 = arith.constant 0 : index
    %c0_0 = arith.constant 0 : index
    %0 = vector.load %arg1[%c0, %c0_0] : memref<8x128xf32, #tpu.memory_space<vmem>>, vector<8x128xf32>
    %c0_1 = arith.constant 0 : index
    %c0_2 = arith.constant 0 : index
    %1 = vector.load %arg2[%c0_1, %c0_2] : memref<128x128xf32, #tpu.memory_space<vmem>>, vector<128x128xf32>
    %cst = arith.constant dense<0.000000e+00> : vector<8x128xf32>
    %2 = tpu.matmul %0, %1, %cst {dimension_numbers = #tpu.dot_dimension_numbers<[1], [0], [0], [1], [0, 0, 1, 1], [], []>} : vector<8x128xf32>, vector<128x128xf32>, vector<8x128xf32> -> vector<8x128xf32>
    %cst_3 = arith.constant 0.000000e+00 : f32
    %3 = vector.broadcast %cst_3 : f32 to vector<8x128xf32>
    %4 = arith.maximumf %2, %3 : vector<8x128xf32>
    %c0_4 = arith.constant 0 : index
    %c0_5 = arith.constant 0 : index
    %5 = vector.load %arg3[%c0_4, %c0_5] : memref<128x128xf32, #tpu.memory_space<vmem>>, vector<128x128xf32>
    %cst_6 = arith.constant dense<0.000000e+00> : vector<8x128xf32>
    %6 = tpu.matmul %4, %5, %cst_6 {dimension_numbers = #tpu.dot_dimension_numbers<[1], [0], [0], [1], [0, 0, 1, 1], [], []>} : vector<8x128xf32>, vector<128x128xf32>, vector<8x128xf32> -> vector<8x128xf32>
    %c0_7 = arith.constant 0 : index
    %c0_8 = arith.constant 0 : index
    %7 = vector.load %arg4[%c0_7, %c0_8] : memref<1x128xf32, #tpu.memory_space<vmem>>, vector<1x128xf32>
    %8 = vector.broadcast %7 : vector<1x128xf32> to vector<8x128xf32>
    %9 = arith.addf %6, %8 : vector<8x128xf32>
    %cst_9 = arith.constant 0.000000e+00 : f32
    %10 = vector.broadcast %cst_9 : f32 to vector<8x128xf32>
    %11 = arith.maximumf %9, %10 : vector<8x128xf32>
    %c0_10 = arith.constant 0 : index
    %c0_11 = arith.constant 0 : index
    %12 = vector.load %arg5[%c0_10, %c0_11] : memref<128x256xf32, #tpu.memory_space<vmem>>, vector<128x256xf32>
    %cst_12 = arith.constant dense<0.000000e+00> : vector<8x256xf32>
    %13 = tpu.matmul %11, %12, %cst_12 {dimension_numbers = #tpu.dot_dimension_numbers<[1], [0], [0], [1], [0, 0, 1, 1], [], []>} : vector<8x128xf32>, vector<128x256xf32>, vector<8x256xf32> -> vector<8x256xf32>
    %c0_13 = arith.constant 0 : index
    %c0_14 = arith.constant 0 : index
    %14 = vector.load %arg6[%c0_13, %c0_14] : memref<1x256xf32, #tpu.memory_space<vmem>>, vector<1x256xf32>
    %15 = vector.broadcast %14 : vector<1x256xf32> to vector<8x256xf32>
    %16 = arith.addf %13, %15 : vector<8x256xf32>
    %17 = vector.extract_strided_slice %16 {offsets = [0, 0], sizes = [8, 128], strides = [1, 1]} : vector<8x256xf32> to vector<8x128xf32>
    %18 = vector.extract_strided_slice %16 {offsets = [0, 128], sizes = [8, 128], strides = [1, 1]} : vector<8x256xf32> to vector<8x128xf32>
    %19 = arith.subf %0, %17 : vector<8x128xf32>
    %cst_15 = arith.constant 5.000000e-01 : f32
    %20 = vector.broadcast %cst_15 : f32 to vector<8x128xf32>
    %21 = arith.mulf %20, %18 : vector<8x128xf32>
    %22 = math.exp %21 : vector<8x128xf32>
    %23 = arith.mulf %19, %22 : vector<8x128xf32>
    %c0_16 = arith.constant 0 : index
    %c0_17 = arith.constant 0 : index
    %24 = vector.load %arg7[%c0_16, %c0_17] : memref<8x128xf32, #tpu.memory_space<vmem>>, vector<8x128xf32>
    tpu.vector_store %arg7[%c0_16, %c0_17], %23 {strides = array<i32>} : memref<8x128xf32, #tpu.memory_space<vmem>>, vector<8x128xf32>,
    %cst_18 = arith.constant dense<0.000000e+00> : vector<8xf32>
    %25 = vector.multi_reduction <add>, %18, %cst_18 [1] : vector<8x128xf32> to vector<8xf32>
    %26 = vector.shape_cast %25 : vector<8xf32> to vector<8x1xf32>
    %27 = vector.shape_cast %26 : vector<8x1xf32> to vector<8x1xf32>
    %28 = vector.broadcast %27 : vector<8x1xf32> to vector<8x128xf32>
    %c0_19 = arith.constant 0 : index
    %c0_20 = arith.constant 0 : index
    %29 = vector.load %arg8[%c0_19, %c0_20] : memref<8x128xf32, #tpu.memory_space<vmem>>, vector<8x128xf32>
    tpu.vector_store %arg8[%c0_19, %c0_20], %28 {strides = array<i32>} : memref<8x128xf32, #tpu.memory_space<vmem>>, vector<8x128xf32>,
    return
  }
  func.func @transform_0(%arg0: i32) -> (i32, i32) {
    %c0_i32 = arith.constant 0 : i32
    %c0_i32_0 = arith.constant 0 : i32
    return %arg0, %c0_i32 : i32, i32
  }
  func.func @transform_1(%arg0: i32) -> (i32, i32) {
    %c0_i32 = arith.constant 0 : i32
    %c0_i32_0 = arith.constant 0 : i32
    %c0_i32_1 = arith.constant 0 : i32
    return %c0_i32, %c0_i32_0 : i32, i32
  }
  func.func @transform_2(%arg0: i32) -> (i32, i32) {
    %c0_i32 = arith.constant 0 : i32
    %c0_i32_0 = arith.constant 0 : i32
    %c0_i32_1 = arith.constant 0 : i32
    return %c0_i32, %c0_i32_0 : i32, i32
  }
  func.func @transform_3(%arg0: i32) -> (i32, i32) {
    %c0_i32 = arith.constant 0 : i32
    %c0_i32_0 = arith.constant 0 : i32
    %c0_i32_1 = arith.constant 0 : i32
    return %c0_i32, %c0_i32_0 : i32, i32
  }
  func.func @transform_4(%arg0: i32) -> (i32, i32) {
    %c0_i32 = arith.constant 0 : i32
    %c0_i32_0 = arith.constant 0 : i32
    %c0_i32_1 = arith.constant 0 : i32
    return %c0_i32, %c0_i32_0 : i32, i32
  }
  func.func @transform_5(%arg0: i32) -> (i32, i32) {
    %c0_i32 = arith.constant 0 : i32
    %c0_i32_0 = arith.constant 0 : i32
    %c0_i32_1 = arith.constant 0 : i32
    return %c0_i32, %c0_i32_0 : i32, i32
  }
  func.func @transform_6(%arg0: i32) -> (i32, i32) {
    %c0_i32 = arith.constant 0 : i32
    %c0_i32_0 = arith.constant 0 : i32
    return %arg0, %c0_i32 : i32, i32
  }
  func.func @transform_7(%arg0: i32) -> (i32, i32) {
    %c0_i32 = arith.constant 0 : i32
    %c0_i32_0 = arith.constant 0 : i32
    return %arg0, %c0_i32 : i32, i32
  }
}

</mosaic_0001>

<bundles_post_ra>
// kernel: squeeze.1
= control target key start
LH: loop header
LB: loop body
LE: loop exit
PB: predicated region body
PF: predicated region fallthrough
CT: control target
= control target key end

     0   :  { %vm7_vm0 = vcmask 64512   ;;  %s39_s0 = inlined_call_operand.vmem [shape: f32[16], index: 0, kind: input, shape index: {}]   ;;  %s40_s1 = inlined_call_operand.vmem [shape: f32[2,8], index: 1, kind: output, shape index: {}]  }
   0x1   :  { %v4_v0 = vld [vmem:[%s39_s0] sm:$0x1]  ;;  %s22_s0 = smov 120  }
   0x2   :  { %5 = vst [vmem:[#allocation1] sm:$0x1] %v4_v0 }
   0x9   :  { %v9_v1 = vld [vmem:[#allocation1] sm:$0x1]  }
   0xa   :  { %v6_v2 = vld [vmem:[#allocation1] sm:$0x1]   ;;  %10 = vrot.lane.b32.xlu0 %v9_v1, %s22_s0 }
   0xb   :  { %8 = vst.msk [vmem:[#allocation0] sm:$0x1] %vm7_vm0, %v6_v2  }
  0x7c   :  { %v11_v3 = vpop.permute.xlu0 %10  }
  0x7d   :  { %14 = vst.msk [vmem:[#allocation0 + $0x1] sm:$0x1] %vm7_vm0, %v11_v3  }
  0x84   :  { %v17_v4 = vld [vmem:[#allocation0] sm:$0x3] }
  0x85   :  { %20 = vst [vmem:[%s40_s1] sm:$0x3] %v17_v4 }

// kernel: _lambda_.1
= control target key start
LH: loop header
LB: loop body
LE: loop exit
PB: predicated region body
PF: predicated region fallthrough
CT: control target
= control target key end

     0   :  { %13 = vsyncpa [#allocation3], 0  ;;  %s908_s0 = inlined_call_operand.vmem [shape: f32[16,128], index: 0, kind: input, shape index: {}]   ;;  %s909_s1 = inlined_call_operand.hbm [shape: f32[128,128], index: 1, kind: input, shape index: {}]   ;;  %s910_s2 = inlined_call_operand.hbm [shape: f32[128,128], index: 2, kind: input, shape index: {}]   ;;  %s911_s3 = inlined_call_operand.vmem [shape: f32[1,128], index: 3, kind: input, shape index: {}]   ;;  %s912_s4 = inlined_call_operand.hbm [shape: f32[128,256], index: 4, kind: input, shape index: {}]   ;;  %s913_s5 = inlined_call_operand.vmem [shape: f32[1,256], index: 5, kind: input, shape index: {}]   ;;  %s914_s6 = inlined_call_operand.vmem [shape: f32[16,128], index: 6, kind: output, shape index: {0}]   ;;  %s915_s7 = inlined_call_operand.vmem [shape: f32[16,128], index: 7, kind: output, shape index: {1}]  }
   0x1   :  { %14 = vsyncpa [#allocation5], 0  ;;  %s831_s24 = smov 0  }
   0x2 LB: > { %s837_s25 = sadd.s32 4294967295, %s782_s24   ;;  %p618_p0 = scmp.ge.s32.totalorder %s782_s24, 1  ;;  %s782_s24 = sphi %s831_s24, %s20_s24  }
   0x3   : > { %p208_p1 = scmp.lt.s32.totalorder %s782_s24, 3  ;;  %p654_p2 = scmp.eq.s32.totalorder %s837_s25, 0 }
   0x4   : > { %s233_s28 = sshll.u32 %s910_s2, 4  ;;  %s219_s9 = sshll.u32 %s909_s1, 4  ;;  %s234_s28 = int_to_ptr.hbm [resolvable:$true] %s233_s28  ;;  %s220_s9 = int_to_ptr.hbm [resolvable:$true] %s219_s9 }
   0x5   : > { %p845_p3 = pnand %p618_p0, %p208_p1  ;;  %s784_s10 = smov [#allocation4]  }
   0x6   : > { %s235_s11 = sshll.u32 %s784_s10, 4  ;;  %s785_s13 = smov [#allocation2]   ;;  %s236_s11 = int_to_ptr.vmem [resolvable:$true] %s235_s11 }
   0x7   : > { %p644_p4 = pneg %p845_p3  ;;  %s221_s14 = sshll.u32 %s785_s13, 4  ;;  %s222_s14 = int_to_ptr.vmem [resolvable:$true] %s221_s14 }
   0x8   : > { %s250_s17 = sshll.u32 %s912_s4, 4  ;;  %s786_s18 = smov 128   ;;  %s251_s17 = int_to_ptr.hbm [resolvable:$true] %s250_s17 }
   0x9   : > { %p856_p5 = pnand %p654_p2, %p644_p4  ;;  %s787_s19 = smov 8  }
   0xa   : > { %s788_s20 = smov [#allocation6]   ;;  %s789_s22 = smov 256  }
   0xb   : > { %650 = dma.hbm_to_vmem [thread:$0]  (!%p856_p5), %s234_s28, 2048, %s236_s11, [#allocation5], %s786_s18, %s786_s18, %s787_s19  }
   0xc   : > { %647 = dma.hbm_to_vmem [thread:$0]  (!%p856_p5), %s220_s9, 2048, %s222_s14, [#allocation3], %s786_s18, %s786_s18, %s787_s19  }
   0xd   : > { %s252_s21 = sshll.u32 %s788_s20, 4  ;;  %s790_s23 = smov 16   ;;  %s253_s21 = int_to_ptr.vmem [resolvable:$true] %s252_s21 }
   0xe   : > { %653 = dma.hbm_to_vmem [thread:$0]  (!%p856_p5), %s251_s17, 4096, %s253_s21, [#allocation5], %s789_s22, %s789_s22, %s790_s23  }
   0xf   : > { %278 = sbr.rel (%p845_p3) target bundleno = 564 (0x234), region = 44 }
  0x14   : > { %773 = dma.done.wait (%p654_p2), [#allocation3], 2048  }
  0x15   : > { %775 = vsyncadd (%p654_p2), [#allocation3], 4294965248 }
  0x16   : > { %777 = dma.done.wait (%p654_p2), [#allocation5], 6144  }
  0x17   : > { %779 = vsyncadd (%p654_p2), [#allocation5], 4294961152  ;;  %v351_v0 = vld [vmem:[#allocation2 + $0x78] sm:$0xff]  ;;  %v350_v1 = vld [vmem:[#allocation2 + $0x70] sm:$0xff]  ;;  %p323_p6 = scmp.lt.s32.totalorder %s837_s25, 1 }
  0x18   : > { %352 = vmatpush.msra.mxu0 %v351_v0  ;;  %v349_v2 = vld [vmem:[#allocation2 + $0x68] sm:$0xff]  ;;  %v348_v3 = vld [vmem:[#allocation2 + $0x60] sm:$0xff]  ;;  %v388_v4 = vld [vmem:[#allocation4 + $0x78] sm:$0xff] }
  0x19   : > { %v347_v5 = vld [vmem:[#allocation2 + $0x58] sm:$0xff]  ;;  %393 = vmatpush.msra.mxu1 %v388_v4  ;;  %v387_v6 = vld [vmem:[#allocation4 + $0x70] sm:$0xff]  ;;  %v386_v7 = vld [vmem:[#allocation4 + $0x68] sm:$0xff]  ;;  %s919_s25 = smov (!%p323_p6, %s837_s25), 1 }
  0x1a   : > { %353 = vmatpush.msra.mxu0 %v350_v1  ;;  %v346_v8 = vld [vmem:[#allocation2 + $0x50] sm:$0xff]  ;;  %v385_v9 = vld [vmem:[#allocation4 + $0x60] sm:$0xff]  ;;  %v345_v10 = vld [vmem:[#allocation2 + $0x48] sm:$0xff]  ;;  %s881_s26 = sshll.u32 %s919_s25, 3 }
  0x1b   : > { %394 = vmatpush.msra.mxu1 %v387_v6  ;;  %v384_v11 = vld [vmem:[#allocation4 + $0x58] sm:$0xff]  ;;  %v344_v12 = vld [vmem:[#allocation2 + $0x40] sm:$0xff]  ;;  %v383_v13 = vld [vmem:[#allocation4 + $0x50] sm:$0xff]  ;;  %s326_s29 = scalar_lea.vmem %s908_s0, %s881_s26  ;;  %s330_s12 = scalar_lea.vmem %s914_s6, %s881_s26 }
  0x1c   : > { %354 = vmatpush.msra.mxu0 %v349_v2  ;;  %v343_v14 = vld [vmem:[#allocation2 + $0x38] sm:$0xff]  ;;  %v382_v15 = vld [vmem:[#allocation4 + $0x48] sm:$0xff]  ;;  %v342_v16 = vld [vmem:[#allocation2 + $0x30] sm:$0xff]  ;;  %s334_s15 = scalar_lea.vmem %s915_s7, %s881_s26 }
  0x1d   : > { %395 = vmatpush.msra.mxu1 %v386_v7  ;;  %v381_v17 = vld [vmem:[#allocation4 + $0x40] sm:$0xff]  ;;  %v341_v18 = vld [vmem:[#allocation2 + $0x28] sm:$0xff]  ;;  %v380_v19 = vld [vmem:[#allocation4 + $0x38] sm:$0xff] }
  0x1e   : > { %355 = vmatpush.msra.mxu0 %v348_v3  ;;  %v340_v20 = vld [vmem:[#allocation2 + $0x20] sm:$0xff]  ;;  %v379_v21 = vld [vmem:[#allocation4 + $0x30] sm:$0xff]  ;;  %v339_v22 = vld [vmem:[#allocation2 + $0x18] sm:$0xff] }
  0x1f   : > { %396 = vmatpush.msra.mxu1 %v385_v9  ;;  %v378_v23 = vld [vmem:[#allocation4 + $0x28] sm:$0xff]  ;;  %v338_v24 = vld [vmem:[#allocation2 + $0x10] sm:$0xff]  ;;  %v377_v25 = vld [vmem:[#allocation4 + $0x20] sm:$0xff] }
  0x20   : > { %356 = vmatpush.msra.mxu0 %v347_v5  ;;  %v337_v26 = vld [vmem:[#allocation2 + $0x8] sm:$0xff]  ;;  %v376_v27 = vld [vmem:[#allocation4 + $0x18] sm:$0xff]  ;;  %v336_v28 = vld [vmem:[#allocation2] sm:$0xff] }
  0x21   : > { %397 = vmatpush.msra.mxu1 %v384_v11  ;;  %v887_v29 = vld [vmem:[%s326_s29] sm:$0xff]  ;;  %v375_v30 = vld [vmem:[#allocation4 + $0x10] sm:$0xff]  ;;  %v374_v31 = vld [vmem:[#allocation4 + $0x8] sm:$0xff] }
  0x22   : > { %357 = vmatpush.msra.mxu0 %v346_v8  ;;  %v373_v32 = vld [vmem:[#allocation4] sm:$0xff]  ;;  %v444_v33 = vld [vmem:[#allocation6 + $0xf0] sm:$0xff]  ;;  %v445_v34 = vld [vmem:[#allocation6 + $0xf8] sm:$0xff] }
  0x23   : > { %398 = vmatpush.msra.mxu1 %v383_v13  ;;  %v442_v35 = vld [vmem:[#allocation6 + $0xe0] sm:$0xff]  ;;  %452 = vmatpush.msra.mxu2 %v444_v33  ;;  %v443_v36 = vld [vmem:[#allocation6 + $0xe8] sm:$0xff]  ;;  %v440_v37 = vld [vmem:[#allocation6 + $0xd0] sm:$0xff] }
  0x24   : > { %358 = vmatpush.msra.mxu0 %v345_v10  ;;  %472 = vmatpush.msra.mxu3 %v445_v34  ;;  %v441_v38 = vld [vmem:[#allocation6 + $0xd8] sm:$0xff]  ;;  %v438_v39 = vld [vmem:[#allocation6 + $0xc0] sm:$0xff]  ;;  %v439_v40 = vld [vmem:[#allocation6 + $0xc8] sm:$0xff] }
  0x25   : > { %399 = vmatpush.msra.mxu1 %v382_v15  ;;  %453 = vmatpush.msra.mxu2 %v442_v35  ;;  %v436_v41 = vld [vmem:[#allocation6 + $0xb0] sm:$0xff]  ;;  %v437_v42 = vld [vmem:[#allocation6 + $0xb8] sm:$0xff]  ;;  %v434_v43 = vld [vmem:[#allocation6 + $0xa0] sm:$0xff] }
  0x26   : > { %359 = vmatpush.msra.mxu0 %v344_v12  ;;  %473 = vmatpush.msra.mxu3 %v443_v36  ;;  %v435_v44 = vld [vmem:[#allocation6 + $0xa8] sm:$0xff]  ;;  %v432_v45 = vld [vmem:[#allocation6 + $0x90] sm:$0xff]  ;;  %v433_v46 = vld [vmem:[#allocation6 + $0x98] sm:$0xff] }
  0x27   : > { %400 = vmatpush.msra.mxu1 %v381_v17  ;;  %454 = vmatpush.msra.mxu2 %v440_v37  ;;  %v430_v47 = vld [vmem:[#allocation6 + $0x80] sm:$0xff]  ;;  %v431_v48 = vld [vmem:[#allocation6 + $0x88] sm:$0xff]  ;;  %v428_v49 = vld [vmem:[#allocation6 + $0x70] sm:$0xff] }
  0x28   : > { %360 = vmatpush.msra.mxu0 %v343_v14  ;;  %474 = vmatpush.msra.mxu3 %v441_v38  ;;  %v429_v50 = vld [vmem:[#allocation6 + $0x78] sm:$0xff]  ;;  %v426_v51 = vld [vmem:[#allocation6 + $0x60] sm:$0xff]  ;;  %v427_v52 = vld [vmem:[#allocation6 + $0x68] sm:$0xff] }
  0x29   : > { %401 = vmatpush.msra.mxu1 %v380_v19  ;;  %455 = vmatpush.msra.mxu2 %v438_v39  ;;  %v424_v53 = vld [vmem:[#allocation6 + $0x50] sm:$0xff]  ;;  %v425_v54 = vld [vmem:[#allocation6 + $0x58] sm:$0xff]  ;;  %v422_v55 = vld [vmem:[#allocation6 + $0x40] sm:$0xff] }
  0x2a   : > { %361 = vmatpush.msra.mxu0 %v342_v16  ;;  %475 = vmatpush.msra.mxu3 %v439_v40  ;;  %v423_v56 = vld [vmem:[#allocation6 + $0x48] sm:$0xff]  ;;  %v420_v57 = vld [vmem:[#allocation6 + $0x30] sm:$0xff]  ;;  %v421_v58 = vld [vmem:[#allocation6 + $0x38] sm:$0xff] }
  0x2b   : > { %402 = vmatpush.msra.mxu1 %v379_v21  ;;  %456 = vmatpush.msra.mxu2 %v436_v41  ;;  %v418_v61 = vld [vmem:[#allocation6 + $0x20] sm:$0xff]  ;;  %v419_v62 = vld [vmem:[#allocation6 + $0x28] sm:$0xff]  ;;  %v416_v63 = vld [vmem:[#allocation6 + $0x10] sm:$0xff] }
  0x2c   : > { %362 = vmatpush.msra.mxu0 %v341_v18  ;;  %476 = vmatpush.msra.mxu3 %v437_v42  ;;  %v417_v0 = vld [vmem:[#allocation6 + $0x18] sm:$0xff]  ;;  %v414_v1 = vld [vmem:[#allocation6] sm:$0xff]  ;;  %v415_v2 = vld [vmem:[#allocation6 + $0x8] sm:$0xff] }
  0x2d   : > { %403 = vmatpush.msra.mxu1 %v378_v23  ;;  %457 = vmatpush.msra.mxu2 %v434_v43  ;;  %v675_v3 = vld [vmem:[%s911_s3] ss:$0 sm:$0xff] }
  0x2e   : > { %363 = vmatpush.msra.mxu0 %v340_v20  ;;  %477 = vmatpush.msra.mxu3 %v435_v44  ;;  %v446_v7 = vld [vmem:[%s913_s5] sm:$0x3] }
  0x2f   : > { %404 = vmatpush.msra.mxu1 %v377_v25  ;;  %458 = vmatpush.msra.mxu2 %v432_v45  ;;  %v449_v8 = vperm.slane %v446_v7, 1  ;;  %v448_v12 = vperm.slane %v446_v7, 0 }
  0x30   : > { %364 = vmatpush.msra.mxu0 %v339_v22  ;;  %478 = vmatpush.msra.mxu3 %v433_v46 }
  0x31   : > { %405 = vmatpush.msra.mxu1 %v376_v27  ;;  %459 = vmatpush.msra.mxu2 %v430_v47 }
  0x32   : > { %365 = vmatpush.msra.mxu0 %v338_v24  ;;  %479 = vmatpush.msra.mxu3 %v431_v48 }
  0x33   : > { %406 = vmatpush.msra.mxu1 %v375_v30  ;;  %460 = vmatpush.msra.mxu2 %v428_v49 }
  0x34   : > { %366 = vmatpush.msra.mxu0 %v337_v26  ;;  %480 = vmatpush.msra.mxu3 %v429_v50 }
  0x35   : > { %407 = vmatpush.msra.mxu1 %v374_v31  ;;  %461 = vmatpush.msra.mxu2 %v426_v51 }
  0x36   : > { %367 = vmatpush.msra.mxu0 %v336_v28  ;;  %481 = vmatpush.msra.mxu3 %v427_v52 }
  0x37   : > { %368 = vmatmul.f32.vlgmr.msra.gmra.mxu0 %v887_v29  ;;  %408 = vmatpush.msra.mxu1 %v373_v32 }
  0x38   : > { %462 = vmatpush.msra.mxu2 %v424_v53  ;;  %482 = vmatpush.msra.mxu3 %v425_v54 }
  0x3a   : > { %463 = vmatpush.msra.mxu2 %v422_v55  ;;  %483 = vmatpush.msra.mxu3 %v423_v56 }
  0x3c   : > { %464 = vmatpush.msra.mxu2 %v420_v57  ;;  %484 = vmatpush.msra.mxu3 %v421_v58 }
  0x3e   : > { %465 = vmatpush.msra.mxu2 %v418_v61  ;;  %485 = vmatpush.msra.mxu3 %v419_v62 }
  0x40   : > { %466 = vmatpush.msra.mxu2 %v416_v63  ;;  %486 = vmatpush.msra.mxu3 %v417_v0 }
  0x42   : > { %467 = vmatpush.msra.mxu2 %v414_v1  ;;  %487 = vmatpush.msra.mxu3 %v415_v2 }
  0xb4   : > { %v369_v59 = vpop.f32.mrf.mxu0 }
  0xb5   : > { %v372_v60 = vmax.f32 %v369_v59, 0.0 }
  0xb7   : > { %409 = vmatmul.f32.vlgmr.msra.gmra.mxu1 %v372_v60 }
 0x134   : > { %v410_v4 = vpop.f32.mrf.mxu1 }
 0x135   : > { %v411_v5 = vadd.f32 %v675_v3, %v410_v4 }
 0x137   : > { %v413_v6 = vmax.f32 %v411_v5, 0.0 }
 0x139   : > { %468 = vmatmul.f32.vlgmr.msra.gmra.mxu2 %v413_v6  ;;  %488 = vmatmul.f32.vlgmr.msra.gmra.mxu3 %v413_v6 }
 0x1bc   : > { %v489_v9 = vpop.f32.mrf.mxu3  ;;  %v469_v13 = vpop.f32.mrf.mxu2 }
 0x1bd   : > { %v490_v10 = vadd.f32 %v489_v9, %v449_v8  ;;  %v470_v15 = vadd.f32 %v469_v13, %v448_v12 }
 0x1bf   : > { %v493_v11 = vmul.f32 0.5, %v490_v10  ;;  %498 = vadd.xlane.f32.xlu0 %v490_v10  ;;  %v492_v16 = vsub.f32 %v887_v29, %v470_v15 }
 0x1c1   : > { %v494_v14 = vmul.f32 1.442695, %v493_v11 }
 0x1c3   : > { %676 = vpow2.f32 %v494_v14 }
 0x1c9   : > { %v677_v17 = vpop.eup %676 }
 0x1ca   : > { %v496_v18 = vmul.f32 %v677_v17, %v492_v16 }
 0x1cc   : > { %497 = vst [vmem:[%s330_s12] sm:$0xff] %v496_v18 }
 0x232   : > { %v499_v19 = vpop.xlane.xlu0 %498 }
 0x233   : > { %500 = vst [vmem:[%s334_s15] sm:$0xff] %v499_v19 }
 0x234 PF: > { %s20_s24 = sadd.s32 1, %s782_s24  }
 0x235   : > { %p17_p7 = scmp.ge.s32.totalorder %s20_s24, 4  }
 0x237   :  { %19 = sbr.rel (!%p17_p7) target bundleno = 2 (0x2), region = 99 }
 0x23c   :  { %534 = vsyncpa [#allocation3], 1 }
 0x23d   :  { %536 = vsyncpa [#allocation3 + $0x1], 1 }
 0x23e   :  { %537 = vsyncpa [#allocation5], 1 }

</bundles_post_ra>
